<compile_context>
chip_gen: v6e
topology: v6e:2x2x1
jax: 0.10.0
libtpu: 0.0.40
codegen_flags: <defaults>
</compile_context>

<pallas_src>
import jax
import jax.numpy as jnp
from jax.experimental import pallas as pl
from jax.experimental.pallas import tpu as pltpu

EMBED_DIM = 32              # per-table embedding width (nn.Embedding(_, 32))
CAT_DIM = 2 * EMBED_DIM     # 64, input width of the Linear layer
PACK = 4                    # samples packed per 128-lane row (4 * 32 = 128)
LANES = PACK * EMBED_DIM    # 128


def _round_up(x, m):
    return ((x + m - 1) // m) * m


def recsys_kernel(u_ref, m_ref, wu_ref, wm_ref, seg_ref, b_ref, o_ref):
    # u_ref  : (R, 128) packed user embeddings, 4 samples per row        (VMEM)
    # m_ref  : (R, 128) packed movie embeddings, 4 samples per row       (VMEM)
    # wu_ref : (1, 128) user half of the Linear weight, tiled 4x         (VMEM)
    # wm_ref : (1, 128) movie half of the Linear weight, tiled 4x        (VMEM)
    # seg_ref: (128, 4) 0/1 segment matrix: lane k contributes to col k//32
    # b_ref  : (1,)     Linear bias                                       (SMEM)
    # o_ref  : (R, 4)   outputs; sample index = 4*row + col
    t = u_ref[...] * wu_ref[...] + m_ref[...] * wm_ref[...]        # VPU, exact f32
    s = jnp.dot(t, seg_ref[...],
                preferred_element_type=jnp.float32,
                precision=jax.lax.Precision.HIGHEST)                # MXU segmented sum (exact)
    o_ref[...] = (s + b_ref[0]).astype(o_ref.dtype)


def recsys_forward(users, movies, params, *, tb=32768):
    """Pallas forward. users/movies: int (B,). Returns (B, 1) float32."""
    users = users.astype(jnp.int32)
    movies = movies.astype(jnp.int32)
    B = users.shape[0]

    # Grid / tile selection: bound padding waste, keep tiles (8,128)-aligned
    # after packing (tb_eff % 32 == 0), and use >= 2 grid steps (megacore)
    # whenever the batch is big enough to be worth splitting.
    split_threshold = min(8192, tb)
    grid = 1 if B <= split_threshold else max(2, pl.cdiv(B, tb))
    tb_eff = _round_up(pl.cdiv(B, grid), PACK * 8)   # 32: pack * sublane align
    bp = grid * tb_eff

    pad = bp - B
    if pad:
        users_p = jnp.pad(users, (0, pad))      # row 0 is always a valid index
        movies_p = jnp.pad(movies, (0, pad))
    else:
        users_p, movies_p = users, movies

    # Embedding lookup stays in XLA (see TODO in header).  The reshape to the
    # packed (bp/4, 128) layout is contiguous and therefore free.
    u4 = params["user_embed"][users_p].reshape(bp // PACK, LANES)
    m4 = params["movie_embed"][movies_p].reshape(bp // PACK, LANES)

    # Split the Linear(64 -> 1) weight into its user / movie halves, each tiled
    # 4x across the packed lanes so the kernel never concatenates or transposes.
    w = params["out_w"]                              # (1, 64)
    wu4 = jnp.tile(w[:, :EMBED_DIM], (1, PACK))      # (1, 128)
    wm4 = jnp.tile(w[:, EMBED_DIM:], (1, PACK))      # (1, 128)
    b = params["out_b"].reshape(1)                   # (1,)

    # 0/1 segment-sum matrix: lane k belongs to packed sample k // 32.
    lane = jnp.arange(LANES, dtype=jnp.int32)
    seg = (lane[:, None] // EMBED_DIM
           == jnp.arange(PACK, dtype=jnp.int32)[None, :]).astype(jnp.float32)   # (128, 4)

    rows = tb_eff // PACK

    out = pl.pallas_call(
        recsys_kernel,
        out_shape=jax.ShapeDtypeStruct((bp // PACK, PACK), jnp.float32),
        grid_spec=pltpu.PrefetchScalarGridSpec(
            num_scalar_prefetch=0,
            grid=(grid,),
            in_specs=[
                pl.BlockSpec((rows, LANES), lambda i: (i, 0)),        # packed user embeds
                pl.BlockSpec((rows, LANES), lambda i: (i, 0)),        # packed movie embeds
                pl.BlockSpec((1, LANES), lambda i: (0, 0)),           # w_u tiled (constant block)
                pl.BlockSpec((1, LANES), lambda i: (0, 0)),           # w_m tiled (constant block)
                pl.BlockSpec((LANES, PACK), lambda i: (0, 0)),        # segment-sum matrix
                pl.BlockSpec(memory_space=pltpu.MemorySpace.SMEM),    # bias scalar
            ],
            out_specs=pl.BlockSpec((rows, PACK), lambda i: (i, 0)),
        ),
        compiler_params=pltpu.CompilerParams(
            dimension_semantics=("parallel",),
            # ~24 MiB double-buffered at tb=32768; v5e's default scoped VMEM is
            # only 16 MiB, and 48 MiB stays under v7x's 64 MiB physical VMEM.
            vmem_limit_bytes=48 * 1024 * 1024,
        ),
    )(u4, m4, wu4, wm4, seg, b)

    # (bp/4, 4) -> (bp, 1) is a free contiguous reshape; drop padded rows.
    return out.reshape(bp, 1)[:B]


def init_params(key, n_users, n_movies):
    """Deterministic synthetic parameters matching the module's shapes."""
    k1, k2, k3, k4 = jax.random.split(key, 4)
    # nn.Embedding default init ~ N(0, 1)
    user_embed = jax.random.normal(k1, (n_users, EMBED_DIM), jnp.float32)
    movie_embed = jax.random.normal(k2, (n_movies, EMBED_DIM), jnp.float32)
    # nn.Linear(64, 1) default init ~ U(-1/sqrt(64), 1/sqrt(64))
    bound = 1.0 / jnp.sqrt(jnp.float32(CAT_DIM))
    out_w = jax.random.uniform(k3, (1, CAT_DIM), jnp.float32, -bound, bound)
    out_b = jax.random.uniform(k4, (1,), jnp.float32, -bound, bound)
    return {
        "user_embed": user_embed,
        "movie_embed": movie_embed,
        "out_w": out_w,
        "out_b": out_b,
    }


def recsys_reference(users, movies, params):
    u = params["user_embed"][users]
    m = params["movie_embed"][movies]
    x = jnp.concatenate([u, m], axis=1)
    y = jnp.dot(x, params["out_w"].T, precision="highest")
    return y + params["out_b"]


if __name__ == "__main__":
    key = jax.random.PRNGKey(0)
    kp, ku, km = jax.random.split(key, 3)

    n_users, n_movies, batch = 10, 12, 8
    params = init_params(kp, n_users, n_movies)
    users = jax.random.randint(ku, (batch,), 0, n_users, dtype=jnp.int32)
    movies = jax.random.randint(km, (batch,), 0, n_movies, dtype=jnp.int32)

    out = jax.block_until_ready(recsys_forward(users, movies, params))
    ref = recsys_reference(users, movies, params)
    assert out.shape == (batch, 1)
    assert jnp.allclose(out, ref, atol=1e-5, rtol=1e-5), "mismatch vs reference"

    # Non-multiple-of-tile batch (padding path).
    users2 = jax.random.randint(ku, (13,), 0, n_users, dtype=jnp.int32)
    movies2 = jax.random.randint(km, (13,), 0, n_movies, dtype=jnp.int32)
    out2 = jax.block_until_ready(recsys_forward(users2, movies2, params))
    ref2 = recsys_reference(users2, movies2, params)
    assert out2.shape == (13, 1)
    assert jnp.allclose(out2, ref2, atol=1e-5, rtol=1e-5), "mismatch (padded path)"

    # Multi-tile grid path (forces grid > 1 with a tiny tile size).
    users3 = jax.random.randint(ku, (200,), 0, n_users, dtype=jnp.int32)
    movies3 = jax.random.randint(km, (200,), 0, n_movies, dtype=jnp.int32)
    out3 = jax.block_until_ready(recsys_forward(users3, movies3, params, tb=64))
    ref3 = recsys_reference(users3, movies3, params)
    assert out3.shape == (200, 1)
    assert jnp.allclose(out3, ref3, atol=1e-5, rtol=1e-5), "mismatch (multi-tile path)"

    print("KERNEL_OK")
</pallas_src>

<mosaic_0001>
module attributes {stable_mosaic.version = 11 : i64} {
  func.func @recsys_kernel(%arg0: i32, %arg1: memref<8x128xf32, #tpu.memory_space<vmem>>, %arg2: memref<8x128xf32, #tpu.memory_space<vmem>>, %arg3: memref<1x128xf32, #tpu.memory_space<vmem>>, %arg4: memref<1x128xf32, #tpu.memory_space<vmem>>, %arg5: memref<128x4xf32, #tpu.memory_space<vmem>>, %arg6: memref<1xf32, #tpu.memory_space<smem>>, %arg7: memref<8x4xf32, #tpu.memory_space<vmem>>) attributes {dimension_semantics = [#tpu.dimension_semantics<parallel>], iteration_bounds = array<i64: 1>, scalar_prefetch = 0 : i64, scratch_operands = 0 : i64, tpu.core_type = #tpu.core_type<tc>, window_params = [{transform_indices = @transform_0, window_bounds = array<i64: 8, 128>}, {transform_indices = @transform_1, window_bounds = array<i64: 8, 128>}, {pipeline_mode = #tpu.pipeline_mode<synchronous>, transform_indices = @transform_2, window_bounds = array<i64: 1, 128>}, {pipeline_mode = #tpu.pipeline_mode<synchronous>, transform_indices = @transform_3, window_bounds = array<i64: 1, 128>}, {pipeline_mode = #tpu.pipeline_mode<synchronous>, transform_indices = @transform_4, window_bounds = array<i64: 128, 4>}, {transform_indices = @transform_5, window_bounds = array<i64: 1>}, {transform_indices = @transform_6, window_bounds = array<i64: 8, 4>}]} {
    %c0 = arith.constant 0 : index
    %c0_0 = arith.constant 0 : index
    %0 = vector.load %arg1[%c0, %c0_0] : memref<8x128xf32, #tpu.memory_space<vmem>>, vector<8x128xf32>
    %c0_1 = arith.constant 0 : index
    %c0_2 = arith.constant 0 : index
    %1 = vector.load %arg3[%c0_1, %c0_2] : memref<1x128xf32, #tpu.memory_space<vmem>>, vector<1x128xf32>
    %2 = vector.broadcast %1 : vector<1x128xf32> to vector<8x128xf32>
    %3 = arith.mulf %0, %2 : vector<8x128xf32>
    %c0_3 = arith.constant 0 : index
    %c0_4 = arith.constant 0 : index
    %4 = vector.load %arg2[%c0_3, %c0_4] : memref<8x128xf32, #tpu.memory_space<vmem>>, vector<8x128xf32>
    %c0_5 = arith.constant 0 : index
    %c0_6 = arith.constant 0 : index
    %5 = vector.load %arg4[%c0_5, %c0_6] : memref<1x128xf32, #tpu.memory_space<vmem>>, vector<1x128xf32>
    %6 = vector.broadcast %5 : vector<1x128xf32> to vector<8x128xf32>
    %7 = arith.mulf %4, %6 : vector<8x128xf32>
    %8 = arith.addf %3, %7 : vector<8x128xf32>
    %c0_7 = arith.constant 0 : index
    %c0_8 = arith.constant 0 : index
    %9 = vector.load %arg5[%c0_7, %c0_8] : memref<128x4xf32, #tpu.memory_space<vmem>>, vector<128x4xf32>
    %cst = arith.constant dense<0.000000e+00> : vector<8x4xf32>
    %10 = tpu.matmul %8, %9, %cst {dimension_numbers = #tpu.dot_dimension_numbers<[1], [0], [0], [1], [0, 0, 1, 1], [], []>, precision = #tpu.contract_precision<fp32>} : vector<8x128xf32>, vector<128x4xf32>, vector<8x4xf32> -> vector<8x4xf32>
    %c0_9 = arith.constant 0 : index
    %11 = memref.load %arg6[%c0_9] : memref<1xf32, #tpu.memory_space<smem>>
    %12 = vector.broadcast %11 : f32 to vector<8x4xf32>
    %13 = arith.addf %10, %12 : vector<8x4xf32>
    %c0_10 = arith.constant 0 : index
    %c0_11 = arith.constant 0 : index
    %14 = vector.load %arg7[%c0_10, %c0_11] : memref<8x4xf32, #tpu.memory_space<vmem>>, vector<8x4xf32>
    tpu.vector_store %arg7[%c0_10, %c0_11], %13 {strides = array<i32>} : memref<8x4xf32, #tpu.memory_space<vmem>>, vector<8x4xf32>,
    return
  }
  func.func @transform_0(%arg0: i32) -> (i32, i32) {
    %c0_i32 = arith.constant 0 : i32
    %c0_i32_0 = arith.constant 0 : i32
    return %arg0, %c0_i32 : i32, i32
  }
  func.func @transform_1(%arg0: i32) -> (i32, i32) {
    %c0_i32 = arith.constant 0 : i32
    %c0_i32_0 = arith.constant 0 : i32
    return %arg0, %c0_i32 : i32, i32
  }
  func.func @transform_2(%arg0: i32) -> (i32, i32) {
    %c0_i32 = arith.constant 0 : i32
    %c0_i32_0 = arith.constant 0 : i32
    %c0_i32_1 = arith.constant 0 : i32
    return %c0_i32, %c0_i32_0 : i32, i32
  }
  func.func @transform_3(%arg0: i32) -> (i32, i32) {
    %c0_i32 = arith.constant 0 : i32
    %c0_i32_0 = arith.constant 0 : i32
    %c0_i32_1 = arith.constant 0 : i32
    return %c0_i32, %c0_i32_0 : i32, i32
  }
  func.func @transform_4(%arg0: i32) -> (i32, i32) {
    %c0_i32 = arith.constant 0 : i32
    %c0_i32_0 = arith.constant 0 : i32
    %c0_i32_1 = arith.constant 0 : i32
    return %c0_i32, %c0_i32_0 : i32, i32
  }
  func.func @transform_5(%arg0: i32) -> i32 {
    %c0_i32 = arith.constant 0 : i32
    %c0_i32_0 = arith.constant 0 : i32
    return %c0_i32 : i32
  }
  func.func @transform_6(%arg0: i32) -> (i32, i32) {
    %c0_i32 = arith.constant 0 : i32
    %c0_i32_0 = arith.constant 0 : i32
    return %arg0, %c0_i32 : i32, i32
  }
}

</mosaic_0001>

<bundles_post_ra>
// kernel: tpu_custom_call.1
= control target key start
LH: loop header
LB: loop body
LE: loop exit
PB: predicated region body
PF: predicated region fallthrough
CT: control target
= control target key end

     0   :  { %v1024_v0 = vmov 0.0   ;;  %vm1025_vm0 = vmmov 0   ;;  %vm702_vm1 = vcmask 31744   ;;  %s1490_s4 = inlined_call_operand.vmem [shape: f32[128,4], index: 4, kind: input, shape index: {}]   ;;  %s1491_s0 = inlined_call_operand.vmem [shape: f32[8,128], index: 0, kind: input, shape index: {}]   ;;  %s1492_s2 = inlined_call_operand.vmem [shape: f32[1,128], index: 2, kind: input, shape index: {}]   ;;  %s1493_s1 = inlined_call_operand.vmem [shape: f32[8,128], index: 1, kind: input, shape index: {}]   ;;  %s1494_s3 = inlined_call_operand.vmem [shape: f32[1,128], index: 3, kind: input, shape index: {}]   ;;  %s1495_s5 = inlined_call_operand.<no memory space> [shape: f32[1], index: 5, kind: input, shape index: {}]   ;;  %s1496_s6 = inlined_call_operand.vmem [shape: f32[8,4], index: 6, kind: output, shape index: {}]  }
   0x1   :  { %812 = vmatprep.subr.mxu0 %v1024_v0  ;;  %v58_v1 = vld [vmem:[%s1490_s4 + $0x78] sm:$0xff]  ;;  %v57_v2 = vld [vmem:[%s1490_s4 + $0x70] sm:$0xff]  ;;  %v56_v3 = vld [vmem:[%s1490_s4 + $0x68] sm:$0xff]  ;;  %847 = vmatprep.subr.mxu1 %v1024_v0 }
   0x2   :  { %v1072_v4 = vand.u32 4294901760, %v58_v1  ;;  %v1074_v5 = vand.u32 4294901760, %v57_v2  ;;  %v1076_v6 = vand.u32 4294901760, %v56_v3  ;;  %v55_v7 = vld [vmem:[%s1490_s4 + $0x60] sm:$0xff]  ;;  %v54_v8 = vld [vmem:[%s1490_s4 + $0x58] sm:$0xff]  ;;  %v53_v9 = vld [vmem:[%s1490_s4 + $0x50] sm:$0xff]  ;;  %844 = vmatprep.mubr.msk.f32.mxu0 %vm1025_vm0, %v1024_v0  ;;  %879 = vmatprep.mubr.msk.f32.mxu1 %vm1025_vm0, %v1024_v0 }
   0x3   :  { %v1091_v10 = vand.u32 4294901760, %v55_v7  ;;  %v1093_v11 = vand.u32 4294901760, %v54_v8  ;;  %v1095_v12 = vand.u32 4294901760, %v53_v9  ;;  %v52_v13 = vld [vmem:[%s1490_s4 + $0x48] sm:$0xff]  ;;  %v51_v14 = vld [vmem:[%s1490_s4 + $0x40] sm:$0xff]  ;;  %v50_v19 = vld [vmem:[%s1490_s4 + $0x38] sm:$0xff] }
   0x4   :  { %813 = vmatpush3.msra.mxu0 %v1072_v4  ;;  %v1105_v15 = vsub.f32 %v58_v1, %v1072_v4  ;;  %v1108_v16 = vsub.f32 %v57_v2, %v1074_v5  ;;  %v1110_v17 = vand.u32 4294901760, %v52_v13  ;;  %v1113_v18 = vsub.f32 %v56_v3, %v1076_v6  ;;  %v49_v26 = vld [vmem:[%s1490_s4 + $0x30] sm:$0xff]  ;;  %v48_v36 = vld [vmem:[%s1490_s4 + $0x28] sm:$0xff]  ;;  %v47_v42 = vld [vmem:[%s1490_s4 + $0x20] sm:$0xff] }
   0x5   :  { %814 = vmatprep.subr.mxu0 %v1024_v0  ;;  %v1120_v20 = vsub.f32 %v55_v7, %v1091_v10  ;;  %v1123_v21 = vsub.f32 %v54_v8, %v1093_v11  ;;  %v1129_v25 = vand.u32 4294901760, %v51_v14  ;;  %v1136_v28 = vand.u32 4294901760, %v50_v19  ;;  %v24_v48 = vld [vmem:[%s1491_s0] sm:$0xff]  ;;  %v46_v51 = vld [vmem:[%s1490_s4 + $0x18] sm:$0xff]  ;;  %v45_v57 = vld [vmem:[%s1490_s4 + $0x10] sm:$0xff] }
   0x6   :  { %815 = vmatpush3.msra.mxu0 %v1074_v5  ;;  %v155_v22 = vand.u32 4294901760, %v1105_v15  ;;  %v162_v23 = vand.u32 4294901760, %v1108_v16  ;;  %v169_v24 = vand.u32 4294901760, %v1113_v18  ;;  %v1140_v30 = vsub.f32 %v53_v9, %v1095_v12  ;;  %v708_v49 = vld [vmem:[%s1492_s2] ss:$0 sm:$0xff]  ;;  %v44_v1 = vld [vmem:[%s1490_s4 + $0x8] sm:$0xff] }
   0x7   :  { %816 = vmatprep.subr.mxu0 %v1024_v0  ;;  %v176_v27 = vand.u32 4294901760, %v1120_v20  ;;  %v183_v29 = vand.u32 4294901760, %v1123_v21  ;;  %v1153_v34 = vsub.f32 %v52_v13, %v1110_v17  ;;  %v1156_v35 = vand.u32 4294901760, %v49_v26  ;;  %v33_v52 = vld [vmem:[%s1493_s1] sm:$0xff] }
   0x8   :  { %817 = vmatpush3.msra.mxu0 %v1076_v6  ;;  %v156_v31 = vsub.f32 %v1105_v15, %v155_v22  ;;  %v163_v32 = vsub.f32 %v1108_v16, %v162_v23  ;;  %v170_v33 = vsub.f32 %v1113_v18, %v169_v24  ;;  %v190_v40 = vand.u32 4294901760, %v1140_v30  ;;  %v709_v53 = vld [vmem:[%s1494_s3] ss:$0 sm:$0xff] }
   0x9   :  { %818 = vmatprep.subr.mxu0 %v1024_v0  ;;  %v177_v39 = vsub.f32 %v1120_v20, %v176_v27  ;;  %v184_v41 = vsub.f32 %v1123_v21, %v183_v29  ;;  %v1174_v43 = vsub.f32 %v51_v14, %v1129_v25  ;;  %v1177_v45 = vand.u32 4294901760, %v48_v36  ;;  %v43_v14 = vld [vmem:[%s1490_s4] sm:$0xff] }
   0xa   :  { %819 = vmatpush3.msra.mxu0 %v1091_v10  ;;  %v157_v37 = vand.u32 4294901760, %v156_v31  ;;  %v164_v38 = vand.u32 4294901760, %v163_v32  ;;  %v171_v44 = vand.u32 4294901760, %v170_v33  ;;  %v197_v46 = vand.u32 4294901760, %v1153_v34 }
   0xb   :  { %820 = vmatprep.subr.mxu0 %v1024_v0  ;;  %v1181_v47 = vsub.f32 %v50_v19, %v1136_v28  ;;  %v204_v50 = vand.u32 4294901760, %v1174_v43  ;;  %v178_v54 = vand.u32 4294901760, %v177_v39  ;;  %v191_v55 = vsub.f32 %v1140_v30, %v190_v40 }
   0xc   :  { %821 = vmatpush3.msra.mxu0 %v1093_v11  ;;  %848 = vmatpush3.msra.mxu1 %v157_v37  ;;  %v1205_v56 = vand.u32 4294901760, %v47_v42  ;;  %v1211_v58 = vsub.f32 %v49_v26, %v1156_v35  ;;  %v185_v59 = vand.u32 4294901760, %v184_v41  ;;  %v32_v61 = vmul.f32 %v708_v49, %v24_v48 }
   0xd   :  { %822 = vmatprep.subr.mxu0 %v1024_v0  ;;  %849 = vmatprep.subr.mxu1 %v1024_v0  ;;  %v211_v60 = vand.u32 4294901760, %v1181_v47  ;;  %v198_v62 = vsub.f32 %v1153_v34, %v197_v46  ;;  %v1220_v63 = vand.u32 4294901760, %v46_v51  ;;  %v1226_v2 = vsub.f32 %v48_v36, %v1177_v45 }
   0xe   :  { %823 = vmatpush3.msra.mxu0 %v1095_v12  ;;  %850 = vmatpush3.msra.mxu1 %v164_v38  ;;  %v41_v3 = vmul.f32 %v709_v53, %v33_v52  ;;  %v205_v7 = vsub.f32 %v1174_v43, %v204_v50  ;;  %v1233_v8 = vand.u32 4294901760, %v45_v57  ;;  %v192_v9 = vand.u32 4294901760, %v191_v55 }
   0xf   :  { %824 = vmatprep.subr.mxu0 %v1024_v0  ;;  %851 = vmatprep.subr.mxu1 %v1024_v0  ;;  %v218_v13 = vand.u32 4294901760, %v1211_v58  ;;  %v1241_v19 = vsub.f32 %v47_v42, %v1205_v56  ;;  %v212_v31 = vsub.f32 %v1181_v47, %v211_v60  ;;  %v1248_v32 = vand.u32 4294901760, %v44_v1 }
  0x10   :  { %825 = vmatpush3.msra.mxu0 %v1110_v17  ;;  %852 = vmatpush3.msra.mxu1 %v171_v44  ;;  %v42_v26 = vadd.f32 %v41_v3, %v32_v61  ;;  %v199_v33 = vand.u32 4294901760, %v198_v62  ;;  %v225_v36 = vand.u32 4294901760, %v1226_v2  ;;  %v1255_v38 = vsub.f32 %v46_v51, %v1220_v63 }
  0x11   :  { %826 = vmatprep.subr.mxu0 %v1024_v0  ;;  %853 = vmatprep.subr.mxu1 %v1024_v0  ;;  %v206_v39 = vand.u32 4294901760, %v205_v7  ;;  %v1259_v41 = vand.u32 4294901760, %v43_v14  ;;  %v219_v42 = vsub.f32 %v1211_v58, %v218_v13  ;;  %v232_v44 = vand.u32 4294901760, %v1241_v19 }
  0x12   :  { %827 = vmatpush3.msra.mxu0 %v1129_v25  ;;  %854 = vmatpush3.msra.mxu1 %v178_v54  ;;  %v1252_v37 = vand.u32 4294901760, %v42_v26  ;;  %v1270_v49 = vsub.f32 %v45_v57, %v1233_v8  ;;  %v213_v51 = vand.u32 4294901760, %v212_v31  ;;  %v226_v52 = vsub.f32 %v1226_v2, %v225_v36 }
  0x13   :  { %828 = vmatprep.subr.mxu0 %v1024_v0  ;;  %855 = vmatprep.subr.mxu1 %v1024_v0  ;;  %v239_v54 = vand.u32 4294901760, %v1255_v38  ;;  %v1281_v55 = vsub.f32 %v44_v1, %v1248_v32  ;;  %v220_v57 = vand.u32 4294901760, %v219_v42  ;;  %v1291_v62 = vsub.f32 %v43_v14, %v1259_v41 }
  0x14   :  { %829 = vmatpush3.msra.mxu0 %v1136_v28  ;;  %856 = vmatpush3.msra.mxu1 %v185_v59  ;;  %v1267_v48 = vsub.f32 %v42_v26, %v1252_v37  ;;  %v233_v59 = vsub.f32 %v1241_v19, %v232_v44  ;;  %v246_v61 = vand.u32 4294901760, %v1270_v49  ;;  %v227_v1 = vand.u32 4294901760, %v226_v52 }
  0x15   :  { %830 = vmatprep.subr.mxu0 %v1024_v0  ;;  %857 = vmatprep.subr.mxu1 %v1024_v0  ;;  %v240_v7 = vsub.f32 %v1255_v38, %v239_v54  ;;  %v260_v31 = vand.u32 4294901760, %v1291_v62 }
  0x16   :  { %831 = vmatpush3.msra.mxu0 %v1156_v35  ;;  %858 = vmatpush3.msra.mxu1 %v192_v9  ;;  %v144_v53 = vand.u32 4294901760, %v1267_v48  ;;  %v253_v9 = vand.u32 4294901760, %v1281_v55  ;;  %v234_v14 = vand.u32 4294901760, %v233_v59  ;;  %v247_v26 = vsub.f32 %v1270_v49, %v246_v61 }
  0x17   :  { %832 = vmatprep.subr.mxu0 %v1024_v0  ;;  %859 = vmatprep.subr.mxu1 %v1024_v0  ;;  %v261_v52 = vsub.f32 %v1291_v62, %v260_v31 }
  0x18   :  { %833 = vmatpush3.msra.mxu0 %v1177_v45  ;;  %860 = vmatpush3.msra.mxu1 %v199_v33  ;;  %v145_v3 = vsub.f32 %v1267_v48, %v144_v53  ;;  %v254_v42 = vsub.f32 %v1281_v55, %v253_v9 }
  0x19   :  { %834 = vmatprep.subr.mxu0 %v1024_v0  ;;  %861 = vmatprep.subr.mxu1 %v1024_v0  ;;  %v262_v59 = vand.u32 4294901760, %v261_v52 }
  0x1a   :  { %835 = vmatpush3.msra.mxu0 %v1205_v56  ;;  %862 = vmatpush3.msra.mxu1 %v206_v39  ;;  %v146_v33 = vand.u32 4294901760, %v145_v3  ;;  %v241_v39 = vand.u32 4294901760, %v240_v7 }
  0x1b   :  { %836 = vmatprep.subr.mxu0 %v1024_v0  ;;  %863 = vmatprep.subr.mxu1 %v1024_v0 }
  0x1c   :  { %837 = vmatpush3.msra.mxu0 %v1220_v63  ;;  %864 = vmatpush3.msra.mxu1 %v213_v51  ;;  %v248_v51 = vand.u32 4294901760, %v247_v26 }
  0x1d   :  { %838 = vmatprep.subr.mxu0 %v1024_v0  ;;  %865 = vmatprep.subr.mxu1 %v1024_v0 }
  0x1e   :  { %839 = vmatpush3.msra.mxu0 %v1233_v8  ;;  %866 = vmatpush3.msra.mxu1 %v220_v57  ;;  %v255_v57 = vand.u32 4294901760, %v254_v42 }
  0x1f   :  { %840 = vmatprep.subr.mxu0 %v1024_v0  ;;  %867 = vmatprep.subr.mxu1 %v1024_v0 }
  0x20   :  { %841 = vmatpush3.msra.mxu0 %v1248_v32  ;;  %868 = vmatpush3.msra.mxu1 %v227_v1 }
  0x21   :  { %842 = vmatprep.subr.mxu0 %v1024_v0  ;;  %869 = vmatprep.subr.mxu1 %v1024_v0 }
  0x22   :  { %843 = vmatpush3.msra.mxu0 %v1259_v41  ;;  %870 = vmatpush3.msra.mxu1 %v234_v14 }
  0x23   :  { %871 = vmatprep.subr.mxu1 %v1024_v0  ;;  %882 = vmatprep.subr.mxu0 %v1024_v0 }
  0x24   :  { %845 = vmatmul.mubr.f32.vlgmr.msra.gmra.mxu0 %v146_v33  ;;  %872 = vmatpush3.msra.mxu1 %v241_v39 }
  0x25   :  { %883 = vmatpush3.msra.mxu0 %v1105_v15  ;;  %873 = vmatprep.subr.mxu1 %v1024_v0 }
  0x26   :  { %884 = vmatprep.subr.mxu0 %v1024_v0  ;;  %874 = vmatpush3.msra.mxu1 %v248_v51 }
  0x27   :  { %885 = vmatpush3.msra.mxu0 %v1108_v16  ;;  %875 = vmatprep.subr.mxu1 %v1024_v0 }
  0x28   :  { %886 = vmatprep.subr.mxu0 %v1024_v0  ;;  %876 = vmatpush3.msra.mxu1 %v255_v57 }
  0x29   :  { %887 = vmatpush3.msra.mxu0 %v1113_v18  ;;  %877 = vmatprep.subr.mxu1 %v1024_v0 }
  0x2a   :  { %888 = vmatprep.subr.mxu0 %v1024_v0  ;;  %878 = vmatpush3.msra.mxu1 %v262_v59 }
  0x2b   :  { %889 = vmatpush3.msra.mxu0 %v1120_v20  ;;  %880 = vmatmul.mubr.f32.vlgmr.msra.gmra.mxu1 %v1252_v37 }
  0x2c   :  { %890 = vmatprep.subr.mxu0 %v1024_v0  ;;  %917 = vmatprep.subr.mxu1 %v1024_v0 }
  0x2d   :  { %891 = vmatpush3.msra.mxu0 %v1123_v21  ;;  %918 = vmatpush3.msra.mxu1 %v1072_v4 }
  0x2e   :  { %892 = vmatprep.subr.mxu0 %v1024_v0  ;;  %919 = vmatprep.subr.mxu1 %v1024_v0 }
  0x2f   :  { %893 = vmatpush3.msra.mxu0 %v1140_v30  ;;  %920 = vmatpush3.msra.mxu1 %v1074_v5 }
  0x30   :  { %894 = vmatprep.subr.mxu0 %v1024_v0  ;;  %921 = vmatprep.subr.mxu1 %v1024_v0 }
  0x31   :  { %895 = vmatpush3.msra.mxu0 %v1153_v34  ;;  %922 = vmatpush3.msra.mxu1 %v1076_v6 }
  0x32   :  { %896 = vmatprep.subr.mxu0 %v1024_v0  ;;  %923 = vmatprep.subr.mxu1 %v1024_v0 }
  0x33   :  { %897 = vmatpush3.msra.mxu0 %v1174_v43  ;;  %924 = vmatpush3.msra.mxu1 %v1091_v10 }
  0x34   :  { %898 = vmatprep.subr.mxu0 %v1024_v0  ;;  %925 = vmatprep.subr.mxu1 %v1024_v0 }
  0x35   :  { %899 = vmatpush3.msra.mxu0 %v1181_v47  ;;  %926 = vmatpush3.msra.mxu1 %v1093_v11 }
  0x36   :  { %900 = vmatprep.subr.mxu0 %v1024_v0  ;;  %927 = vmatprep.subr.mxu1 %v1024_v0 }
  0x37   :  { %901 = vmatpush3.msra.mxu0 %v1211_v58  ;;  %928 = vmatpush3.msra.mxu1 %v1095_v12 }
  0x38   :  { %902 = vmatprep.subr.mxu0 %v1024_v0  ;;  %929 = vmatprep.subr.mxu1 %v1024_v0 }
  0x39   :  { %903 = vmatpush3.msra.mxu0 %v1226_v2  ;;  %930 = vmatpush3.msra.mxu1 %v1110_v17 }
  0x3a   :  { %904 = vmatprep.subr.mxu0 %v1024_v0  ;;  %931 = vmatprep.subr.mxu1 %v1024_v0 }
  0x3b   :  { %905 = vmatpush3.msra.mxu0 %v1241_v19  ;;  %932 = vmatpush3.msra.mxu1 %v1129_v25 }
  0x3c   :  { %906 = vmatprep.subr.mxu0 %v1024_v0  ;;  %933 = vmatprep.subr.mxu1 %v1024_v0 }
  0x3d   :  { %907 = vmatpush3.msra.mxu0 %v1255_v38  ;;  %934 = vmatpush3.msra.mxu1 %v1136_v28 }
  0x3e   :  { %908 = vmatprep.subr.mxu0 %v1024_v0  ;;  %935 = vmatprep.subr.mxu1 %v1024_v0 }
  0x3f   :  { %909 = vmatpush3.msra.mxu0 %v1270_v49  ;;  %936 = vmatpush3.msra.mxu1 %v1156_v35 }
  0x40   :  { %910 = vmatprep.subr.mxu0 %v1024_v0  ;;  %937 = vmatprep.subr.mxu1 %v1024_v0 }
  0x41   :  { %911 = vmatpush3.msra.mxu0 %v1281_v55  ;;  %938 = vmatpush3.msra.mxu1 %v1177_v45 }
  0x42   :  { %912 = vmatprep.subr.mxu0 %v1024_v0  ;;  %939 = vmatprep.subr.mxu1 %v1024_v0 }
  0x43   :  { %913 = vmatpush3.msra.mxu0 %v1291_v62  ;;  %914 = vmatprep.mubr.msk.f32.mxu0 %vm1025_vm0, %v1024_v0 }
  0x44   :  { %940 = vmatpush3.msra.mxu1 %v1205_v56  ;;  %915 = vmatmul.mubr.f32.vlgmr.msra.gmra.mxu0 %v1267_v48 }
  0x45   :  { %941 = vmatprep.subr.mxu1 %v1024_v0  ;;  %952 = vmatprep.subr.mxu0 %v1024_v0 }
  0x46   :  { %942 = vmatpush3.msra.mxu1 %v1220_v63  ;;  %953 = vmatpush3.msra.mxu0 %v155_v22 }
  0x47   :  { %943 = vmatprep.subr.mxu1 %v1024_v0  ;;  %954 = vmatprep.subr.mxu0 %v1024_v0 }
  0x48   :  { %944 = vmatpush3.msra.mxu1 %v1233_v8  ;;  %955 = vmatpush3.msra.mxu0 %v162_v23 }
  0x49   :  { %945 = vmatprep.subr.mxu1 %v1024_v0  ;;  %956 = vmatprep.subr.mxu0 %v1024_v0 }
  0x4a   :  { %946 = vmatpush3.msra.mxu1 %v1248_v32  ;;  %957 = vmatpush3.msra.mxu0 %v169_v24 }
  0x4b   :  { %947 = vmatprep.subr.mxu1 %v1024_v0  ;;  %958 = vmatprep.subr.mxu0 %v1024_v0 }
  0x4c   :  { %948 = vmatpush3.msra.mxu1 %v1259_v41  ;;  %949 = vmatprep.mubr.msk.f32.mxu1 %vm1025_vm0, %v1024_v0 }
  0x4d   :  { %959 = vmatpush3.msra.mxu0 %v176_v27  ;;  %950 = vmatmul.mubr.f32.vlgmr.msra.gmra.mxu1 %v144_v53 }
  0x4e   :  { %960 = vmatprep.subr.mxu0 %v1024_v0  ;;  %987 = vmatprep.subr.mxu1 %v1024_v0 }
  0x4f   :  { %961 = vmatpush3.msra.mxu0 %v183_v29  ;;  %988 = vmatpush3.msra.mxu1 %v1072_v4 }
  0x50   :  { %962 = vmatprep.subr.mxu0 %v1024_v0  ;;  %989 = vmatprep.subr.mxu1 %v1024_v0 }
  0x51   :  { %963 = vmatpush3.msra.mxu0 %v190_v40  ;;  %990 = vmatpush3.msra.mxu1 %v1074_v5 }
  0x52   :  { %964 = vmatprep.subr.mxu0 %v1024_v0  ;;  %991 = vmatprep.subr.mxu1 %v1024_v0 }
  0x53   :  { %965 = vmatpush3.msra.mxu0 %v197_v46  ;;  %992 = vmatpush3.msra.mxu1 %v1076_v6 }
  0x54   :  { %966 = vmatprep.subr.mxu0 %v1024_v0  ;;  %993 = vmatprep.subr.mxu1 %v1024_v0 }
  0x55   :  { %967 = vmatpush3.msra.mxu0 %v204_v50  ;;  %994 = vmatpush3.msra.mxu1 %v1091_v10 }
  0x56   :  { %968 = vmatprep.subr.mxu0 %v1024_v0  ;;  %995 = vmatprep.subr.mxu1 %v1024_v0 }
  0x57   :  { %969 = vmatpush3.msra.mxu0 %v211_v60  ;;  %996 = vmatpush3.msra.mxu1 %v1093_v11 }
  0x58   :  { %970 = vmatprep.subr.mxu0 %v1024_v0  ;;  %997 = vmatprep.subr.mxu1 %v1024_v0 }
  0x59   :  { %971 = vmatpush3.msra.mxu0 %v218_v13  ;;  %998 = vmatpush3.msra.mxu1 %v1095_v12 }
  0x5a   :  { %972 = vmatprep.subr.mxu0 %v1024_v0  ;;  %999 = vmatprep.subr.mxu1 %v1024_v0 }
  0x5b   :  { %973 = vmatpush3.msra.mxu0 %v225_v36  ;;  %1000 = vmatpush3.msra.mxu1 %v1110_v17  ;;  %v60_v17 = vstv %s1495_s5 }
  0x5c   :  { %974 = vmatprep.subr.mxu0 %v1024_v0  ;;  %1001 = vmatprep.subr.mxu1 %v1024_v0 }
  0x5d   :  { %975 = vmatpush3.msra.mxu0 %v232_v44  ;;  %1002 = vmatpush3.msra.mxu1 %v1129_v25 }
  0x5e   :  { %976 = vmatprep.subr.mxu0 %v1024_v0  ;;  %1003 = vmatprep.subr.mxu1 %v1024_v0 }
  0x5f   :  { %977 = vmatpush3.msra.mxu0 %v239_v54  ;;  %1004 = vmatpush3.msra.mxu1 %v1136_v28 }
  0x60   :  { %978 = vmatprep.subr.mxu0 %v1024_v0  ;;  %1005 = vmatprep.subr.mxu1 %v1024_v0 }
  0x61   :  { %979 = vmatpush3.msra.mxu0 %v246_v61  ;;  %1006 = vmatpush3.msra.mxu1 %v1156_v35 }
  0x62   :  { %980 = vmatprep.subr.mxu0 %v1024_v0  ;;  %1007 = vmatprep.subr.mxu1 %v1024_v0 }
  0x63   :  { %981 = vmatpush3.msra.mxu0 %v253_v9  ;;  %1008 = vmatpush3.msra.mxu1 %v1177_v45 }
  0x64   :  { %982 = vmatprep.subr.mxu0 %v1024_v0  ;;  %1009 = vmatprep.subr.mxu1 %v1024_v0 }
  0x65   :  { %983 = vmatpush3.msra.mxu0 %v260_v31  ;;  %984 = vmatprep.mubr.msk.f32.mxu0 %vm1025_vm0, %v1024_v0 }
  0x66   :  { %1010 = vmatpush3.msra.mxu1 %v1205_v56  ;;  %985 = vmatmul.mubr.f32.vlgmr.msra.gmra.mxu0 %v1252_v37 }
  0x67   :  { %1011 = vmatprep.subr.mxu1 %v1024_v0  ;;  %1019 = vmatprep.mubr.msk.f32.mxu1 %vm1025_vm0, %v1024_v0 }
  0x68   :  { %1012 = vmatpush3.msra.mxu1 %v1220_v63 }
  0x69   :  { %1013 = vmatprep.subr.mxu1 %v1024_v0 }
  0x6a   :  { %1014 = vmatpush3.msra.mxu1 %v1233_v8 }
  0x6b   :  { %1015 = vmatprep.subr.mxu1 %v1024_v0 }
  0x6c   :  { %1016 = vmatpush3.msra.mxu1 %v1248_v32 }
  0x6d   :  { %1017 = vmatprep.subr.mxu1 %v1024_v0 }
  0x6e   :  { %1018 = vmatpush3.msra.mxu1 %v1259_v41 }
  0x6f   :  { %1020 = vmatmul.mubr.f32.vlgmr.msra.gmra.mxu1 %v1252_v37 }
  0xe4   :  { %v148_v4 = vpop.f32.mrf.mxu0 }
  0xe5   :  { %v149_v18 = vadd.f32 %v148_v4, %v60_v17 }
  0xe6   :  { %v846_v5 = vpop.f32.mrf.mxu0 }
  0xeb   :  { %v299_v6 = vpop.f32.mrf.mxu1 }
  0xec   :  { %v300_v21 = vadd.f32 %v299_v6, %v149_v18 }
  0xed   :  { %v881_v10 = vpop.f32.mrf.mxu1 }
 0x104   :  { %v403_v11 = vpop.f32.mrf.mxu0 }
 0x105   :  { %v404_v22 = vadd.f32 %v403_v11, %v300_v21 }
 0x106   :  { %v916_v12 = vpop.f32.mrf.mxu0 }
 0x10d   :  { %v492_v15 = vpop.f32.mrf.mxu1 }
 0x10e   :  { %v493_v23 = vadd.f32 %v492_v15, %v404_v22 }
 0x10f   :  { %v951_v16 = vpop.f32.mrf.mxu1 }
 0x126   :  { %v611_v20 = vpop.f32.mrf.mxu0 }
 0x127   :  { %v612_v24 = vadd.f32 %v611_v20, %v493_v23 }
 0x128   :  { %v986_v0 = vpop.f32.mrf.mxu0 }
 0x12f   :  { %v698_v25 = vpop.f32.mrf.mxu1 }
 0x130   :  { %v699_v27 = vadd.f32 %v698_v25, %v612_v24 }
 0x131   :  { %v1021_v28 = vpop.f32.mrf.mxu1 }
 0x132   :  { %703 = vst.msk [vmem:[%s1496_s6] sm:$0xff] %vm702_vm1, %v699_v27 }

</bundles_post_ra>
